<compile_context>
chip_gen: v7x
topology: tpu7x:2x2x1
jax: 0.10.0
libtpu: 0.0.40
codegen_flags: <defaults>
</compile_context>

<pallas_src>
import functools

import numpy as np

import jax
import jax.numpy as jnp
from jax.experimental import pallas as pl
from jax.experimental.pallas import tpu as pltpu


def _round_up(x, m):
    return ((x + m - 1) // m) * m


# ----------------------------- kernels --------------------------------------

def _ffn_kernel_split(x_ref, w1_ref, b1_ref, wh_ref, bh_ref, out_ref, *, split):
    # linear_1 + ReLU (+ identity dropout, eval mode); accumulate in f32.
    h = jnp.dot(x_ref[...], w1_ref[...], preferred_element_type=jnp.float32)
    h = jnp.maximum(h + b1_ref[...], 0.0).astype(wh_ref.dtype)
    # single fused head matmul: (tb, D) @ (D, Np) -> (tb, Np)
    y = jnp.dot(h, wh_ref[...], preferred_element_type=jnp.float32) + bh_ref[...]
    # lane-aligned activation split: first `split` cols tanh, rest softplus.
    out_ref[:, :split] = jnp.tanh(y[:, :split]).astype(out_ref.dtype)
    out_ref[:, split:] = jax.nn.softplus(y[:, split:]).astype(out_ref.dtype)


def _ffn_kernel_mask(x_ref, w1_ref, b1_ref, wh_ref, bh_ref, mask_ref, out_ref):
    h = jnp.dot(x_ref[...], w1_ref[...], preferred_element_type=jnp.float32)
    h = jnp.maximum(h + b1_ref[...], 0.0).astype(wh_ref.dtype)
    y = jnp.dot(h, wh_ref[...], preferred_element_type=jnp.float32) + bh_ref[...]
    # Precomputed per-column activation mask (1 -> tanh, 0 -> softplus).
    out = jnp.where(mask_ref[...] != 0.0, jnp.tanh(y), jax.nn.softplus(y))
    out_ref[...] = out.astype(out_ref.dtype)


# ------------------------- parameter preparation ----------------------------

def prepare_params(params, *, compute_dtype=jnp.float32):
    """One-time fusion of the four head weights into a single (D, Np) matmul.

    Call once (outside the hot path) and reuse the result across forwards.
    Set compute_dtype=jnp.bfloat16 to halve weight DMA bytes / use bf16 MXU.
    """
    D = params["w1"].shape[0]
    L = params["wm1"].shape[1]
    cdt = np.dtype(compute_dtype)

    if (2 * L) % 128 == 0:
        # Lane-aligned layout [wm1 wm2 | ws1 ws2]: tanh on cols [0, 2L),
        # softplus on [2L, 4L). No padding, no per-element activation mask.
        wh = jnp.concatenate([params["wm1"], params["wm2"],
                              params["ws1"], params["ws2"]], axis=1)
        bh = jnp.concatenate([params["bm1"], params["bm2"],
                              params["bs1"], params["bs2"]], axis=1)
        Np, split, mask, layout = 4 * L, 2 * L, None, "split"
    else:
        # Tiny L: keep [wm1 ws1 wm2 ws2], pad to a 128-lane multiple and carry
        # a precomputed per-column is_tanh mask.
        wh = jnp.concatenate([params["wm1"], params["ws1"],
                              params["wm2"], params["ws2"]], axis=1)
        bh = jnp.concatenate([params["bm1"], params["bs1"],
                              params["bm2"], params["bs2"]], axis=1)
        Np = max(128, _round_up(4 * L, 128))
        pad = Np - 4 * L
        if pad:
            wh = jnp.pad(wh, ((0, 0), (0, pad)))
            bh = jnp.pad(bh, ((0, 0), (0, pad)))
        col = jnp.arange(Np)
        mask = (((col // L) % 2) == 0).astype(jnp.float32)[None, :]
        split, layout = None, "mask"

    return dict(
        w1=params["w1"].astype(cdt),
        b1=params["b1"].astype(jnp.float32),
        wh=wh.astype(cdt),
        bh=bh.astype(jnp.float32),
        mask=mask,
        d_model=D, latent_dim=L, n_fused=Np, split=split, layout=layout,
        compute_dtype=cdt,
    )


# ------------------------------ forward -------------------------------------

def feed_forward(x, prep, *, tile_b=512):
    """x: (B, d_model) float32. Returns (mu1, log_std1, mu2, log_std2), each (B, latent_dim)."""
    B, D = x.shape
    assert D == prep["d_model"]
    L, Np = prep["latent_dim"], prep["n_fused"]
    cdt = prep["compute_dtype"]
    itemsize = cdt.itemsize

    x = x.astype(cdt)

    # ---- batch tiling ----
    # Large batch: tile_b rows/step (multiple of 256 -> full MXU M on v6e/v7x).
    # Small batch: aim for 2 grid steps so v7x's second TensorCore gets work.
    if B > tile_b:
        tb = tile_b
    elif B > 8:
        tb = _round_up(pl.cdiv(B, 2), 8)
    else:
        tb = 8
    B_pad = _round_up(B, tb)
    x_p = jnp.pad(x, ((0, B_pad - B), (0, 0))) if B_pad != B else x
    grid = (B_pad // tb,)

    # ---- specs: weights/biases/mask are resident & single-buffered ----
    resident = pl.Buffered(1)
    x_spec = pl.BlockSpec((tb, D), lambda i: (i, 0))
    out_spec = pl.BlockSpec((tb, Np), lambda i: (i, 0))
    w1_spec = pl.BlockSpec((D, D), lambda i: (0, 0), pipeline_mode=resident)
    b1_spec = pl.BlockSpec((1, D), lambda i: (0, 0), pipeline_mode=resident)
    wh_spec = pl.BlockSpec((D, Np), lambda i: (0, 0), pipeline_mode=resident)
    bh_spec = pl.BlockSpec((1, Np), lambda i: (0, 0), pipeline_mode=resident)

    in_specs = [x_spec, w1_spec, b1_spec, wh_spec, bh_spec]
    operands = [x_p, prep["w1"], prep["b1"], prep["wh"], prep["bh"]]
    if prep["layout"] == "split":
        kernel = functools.partial(_ffn_kernel_split, split=prep["split"])
        transc_per_elem = 2
    else:
        mask_spec = pl.BlockSpec((1, Np), lambda i: (0, 0), pipeline_mode=resident)
        in_specs.append(mask_spec)
        operands.append(prep["mask"])
        kernel = _ffn_kernel_mask
        transc_per_elem = 3

    # ---- VMEM budget: single-buffered weights + double-buffered x/out tiles ----
    weight_bytes = (D * D + D * Np) * itemsize + (D + Np) * 4
    if prep["mask"] is not None:
        weight_bytes += Np * 4
    io_bytes = 2 * tb * D * itemsize + 2 * tb * Np * 4
    vmem_limit = int(min(max(weight_bytes + io_bytes + (4 << 20), 16 << 20), 64 << 20))
    # TODO(synk): for very large d_model (resident weights > ~48 MiB, esp. on
    # v7x's 64 MiB VMEM) add a K-tiled reduction grid axis for w1 instead of
    # keeping it fully resident.

    cost = pl.CostEstimate(
        flops=2 * B_pad * D * (D + Np) + 2 * B_pad * (D + Np),
        transcendentals=transc_per_elem * B_pad * Np,
        bytes_accessed=B_pad * D * itemsize + B_pad * Np * 4
        + (D * D + D * Np) * itemsize + (D + Np) * 4,
    )

    out = pl.pallas_call(
        kernel,
        out_shape=jax.ShapeDtypeStruct((B_pad, Np), jnp.float32),
        grid_spec=pltpu.PrefetchScalarGridSpec(
            num_scalar_prefetch=0,
            grid=grid,
            in_specs=in_specs,
            out_specs=out_spec,
        ),
        compiler_params=pltpu.CompilerParams(
            dimension_semantics=("parallel",),
            vmem_limit_bytes=vmem_limit,
        ),
        cost_estimate=cost,
    )(*operands)

    out = out[:B]
    if prep["layout"] == "split":
        mu1 = out[:, 0 * L:1 * L]
        mu2 = out[:, 1 * L:2 * L]
        ls1 = out[:, 2 * L:3 * L]
        ls2 = out[:, 3 * L:4 * L]
    else:
        mu1 = out[:, 0 * L:1 * L]
        ls1 = out[:, 1 * L:2 * L]
        mu2 = out[:, 2 * L:3 * L]
        ls2 = out[:, 3 * L:4 * L]
    return mu1, ls1, mu2, ls2


# ------------------------------ init / ref ----------------------------------

def init_params(key, d_model, latent_dim):
    """Deterministic init. Weights stored as (in, out) = PyTorch W.T; biases as (1, out)."""
    ks = jax.random.split(key, 10)

    def lin(kw, kb, fan_in, fan_out):
        bound = 1.0 / jnp.sqrt(fan_in)
        w = jax.random.uniform(kw, (fan_in, fan_out), jnp.float32, -bound, bound)
        b = jax.random.uniform(kb, (1, fan_out), jnp.float32, -bound, bound)
        return w, b

    w1, b1 = lin(ks[0], ks[1], d_model, d_model)
    wm1, bm1 = lin(ks[2], ks[3], d_model, latent_dim)
    ws1, bs1 = lin(ks[4], ks[5], d_model, latent_dim)
    wm2, bm2 = lin(ks[6], ks[7], d_model, latent_dim)
    ws2, bs2 = lin(ks[8], ks[9], d_model, latent_dim)
    return dict(w1=w1, b1=b1, wm1=wm1, bm1=bm1, ws1=ws1, bs1=bs1,
                wm2=wm2, bm2=bm2, ws2=ws2, bs2=bs2)


def feed_forward_ref(x, p):
    h = jnp.maximum(x @ p["w1"] + p["b1"], 0.0)
    mu1 = jnp.tanh(h @ p["wm1"] + p["bm1"])
    ls1 = jax.nn.softplus(h @ p["ws1"] + p["bs1"])
    mu2 = jnp.tanh(h @ p["wm2"] + p["bm2"])
    ls2 = jax.nn.softplus(h @ p["ws2"] + p["bs2"])
    return mu1, ls1, mu2, ls2


if __name__ == "__main__":
    d_model, latent_dim = 32, 16
    batch = 16

    key = jax.random.PRNGKey(0)
    kx, kp = jax.random.split(key)
    x = jax.random.normal(kx, (batch, d_model), jnp.float32)
    params = init_params(kp, d_model, latent_dim)

    prep = prepare_params(params)   # one-time head fusion (hoisted out of the hot path)

    outs = feed_forward(x, prep)
    outs = jax.block_until_ready(outs)

    refs = feed_forward_ref(x, params)
    for o, r in zip(outs, refs):
        assert o.shape == (batch, latent_dim), o.shape
        assert jnp.allclose(o, r, atol=1e-5, rtol=1e-5)

    print("KERNEL_OK")
</pallas_src>

<mosaic_0001>
module attributes {stable_mosaic.version = 11 : i64} {
  func.func @_ffn_kernel_mask(%arg0: i32, %arg1: memref<8x32xf32, #tpu.memory_space<vmem>>, %arg2: memref<32x32xf32, #tpu.memory_space<vmem>>, %arg3: memref<1x32xf32, #tpu.memory_space<vmem>>, %arg4: memref<32x128xf32, #tpu.memory_space<vmem>>, %arg5: memref<1x128xf32, #tpu.memory_space<vmem>>, %arg6: memref<1x128xf32, #tpu.memory_space<vmem>>, %arg7: memref<8x128xf32, #tpu.memory_space<vmem>>) attributes {dimension_semantics = [#tpu.dimension_semantics<parallel>], iteration_bounds = array<i64: 2>, scalar_prefetch = 0 : i64, scratch_operands = 0 : i64, tpu.core_type = #tpu.core_type<tc>, window_params = [{transform_indices = @transform_0, window_bounds = array<i64: 8, 32>}, {pipeline_mode = #tpu.pipeline_mode<synchronous>, transform_indices = @transform_1, window_bounds = array<i64: 32, 32>}, {pipeline_mode = #tpu.pipeline_mode<synchronous>, transform_indices = @transform_2, window_bounds = array<i64: 1, 32>}, {pipeline_mode = #tpu.pipeline_mode<synchronous>, transform_indices = @transform_3, window_bounds = array<i64: 32, 128>}, {pipeline_mode = #tpu.pipeline_mode<synchronous>, transform_indices = @transform_4, window_bounds = array<i64: 1, 128>}, {pipeline_mode = #tpu.pipeline_mode<synchronous>, transform_indices = @transform_5, window_bounds = array<i64: 1, 128>}, {transform_indices = @transform_6, window_bounds = array<i64: 8, 128>}]} {
    %c0 = arith.constant 0 : index
    %c0_0 = arith.constant 0 : index
    %0 = vector.load %arg1[%c0, %c0_0] : memref<8x32xf32, #tpu.memory_space<vmem>>, vector<8x32xf32>
    %c0_1 = arith.constant 0 : index
    %c0_2 = arith.constant 0 : index
    %1 = vector.load %arg2[%c0_1, %c0_2] : memref<32x32xf32, #tpu.memory_space<vmem>>, vector<32x32xf32>
    %cst = arith.constant dense<0.000000e+00> : vector<8x32xf32>
    %2 = tpu.matmul %0, %1, %cst {dimension_numbers = #tpu.dot_dimension_numbers<[1], [0], [0], [1], [0, 0, 1, 1], [], []>} : vector<8x32xf32>, vector<32x32xf32>, vector<8x32xf32> -> vector<8x32xf32>
    %c0_3 = arith.constant 0 : index
    %c0_4 = arith.constant 0 : index
    %3 = vector.load %arg3[%c0_3, %c0_4] : memref<1x32xf32, #tpu.memory_space<vmem>>, vector<1x32xf32>
    %4 = vector.broadcast %3 : vector<1x32xf32> to vector<8x32xf32>
    %5 = arith.addf %2, %4 : vector<8x32xf32>
    %cst_5 = arith.constant 0.000000e+00 : f32
    %6 = vector.broadcast %cst_5 : f32 to vector<8x32xf32>
    %7 = arith.maximumf %5, %6 : vector<8x32xf32>
    %c0_6 = arith.constant 0 : index
    %c0_7 = arith.constant 0 : index
    %8 = vector.load %arg4[%c0_6, %c0_7] : memref<32x128xf32, #tpu.memory_space<vmem>>, vector<32x128xf32>
    %cst_8 = arith.constant dense<0.000000e+00> : vector<8x128xf32>
    %9 = tpu.matmul %7, %8, %cst_8 {dimension_numbers = #tpu.dot_dimension_numbers<[1], [0], [0], [1], [0, 0, 1, 1], [], []>} : vector<8x32xf32>, vector<32x128xf32>, vector<8x128xf32> -> vector<8x128xf32>
    %c0_9 = arith.constant 0 : index
    %c0_10 = arith.constant 0 : index
    %10 = vector.load %arg5[%c0_9, %c0_10] : memref<1x128xf32, #tpu.memory_space<vmem>>, vector<1x128xf32>
    %11 = vector.broadcast %10 : vector<1x128xf32> to vector<8x128xf32>
    %12 = arith.addf %9, %11 : vector<8x128xf32>
    %c0_11 = arith.constant 0 : index
    %c0_12 = arith.constant 0 : index
    %13 = vector.load %arg6[%c0_11, %c0_12] : memref<1x128xf32, #tpu.memory_space<vmem>>, vector<1x128xf32>
    %cst_13 = arith.constant 0.000000e+00 : f32
    %14 = vector.broadcast %cst_13 : f32 to vector<1x128xf32>
    %15 = arith.cmpf one, %13, %14 : vector<1x128xf32>
    %16 = math.tanh %12 : vector<8x128xf32>
    %cst_14 = arith.constant 0.000000e+00 : f32
    %17 = vector.broadcast %cst_14 : f32 to vector<8x128xf32>
    %18 = arith.maximumf %12, %17 : vector<8x128xf32>
    %19 = vector.broadcast %cst_14 : f32 to vector<8x128xf32>
    %20 = arith.subf %12, %19 : vector<8x128xf32>
    %21 = arith.cmpf one, %20, %20 : vector<8x128xf32>
    %22 = vector.broadcast %cst_14 : f32 to vector<8x128xf32>
    %23 = arith.addf %12, %22 : vector<8x128xf32>
    %24 = math.absf %20 : vector<8x128xf32>
    %cst_15 = arith.constant 0.000000e+00 : f32
    %25 = vector.broadcast %cst_15 : f32 to vector<8x128xf32>
    %26 = arith.subf %25, %24 : vector<8x128xf32>
    %27 = math.exp %26 : vector<8x128xf32>
    %28 = math.log1p %27 : vector<8x128xf32>
    %29 = arith.addf %18, %28 : vector<8x128xf32>
    %30 = arith.select %21, %23, %29 : vector<8x128xi1>, vector<8x128xf32>
    %31 = vector.shape_cast %15 : vector<1x128xi1> to vector<1x128xi1>
    %32 = vector.broadcast %31 : vector<1x128xi1> to vector<8x128xi1>
    %33 = arith.select %32, %16, %30 : vector<8x128xi1>, vector<8x128xf32>
    %c0_16 = arith.constant 0 : index
    %c0_17 = arith.constant 0 : index
    %34 = vector.load %arg7[%c0_16, %c0_17] : memref<8x128xf32, #tpu.memory_space<vmem>>, vector<8x128xf32>
    tpu.vector_store %arg7[%c0_16, %c0_17], %33 {strides = array<i32>} : memref<8x128xf32, #tpu.memory_space<vmem>>, vector<8x128xf32>,
    return
  }
  func.func @transform_0(%arg0: i32) -> (i32, i32) {
    %c0_i32 = arith.constant 0 : i32
    %c0_i32_0 = arith.constant 0 : i32
    return %arg0, %c0_i32 : i32, i32
  }
  func.func @transform_1(%arg0: i32) -> (i32, i32) {
    %c0_i32 = arith.constant 0 : i32
    %c0_i32_0 = arith.constant 0 : i32
    %c0_i32_1 = arith.constant 0 : i32
    return %c0_i32, %c0_i32_0 : i32, i32
  }
  func.func @transform_2(%arg0: i32) -> (i32, i32) {
    %c0_i32 = arith.constant 0 : i32
    %c0_i32_0 = arith.constant 0 : i32
    %c0_i32_1 = arith.constant 0 : i32
    return %c0_i32, %c0_i32_0 : i32, i32
  }
  func.func @transform_3(%arg0: i32) -> (i32, i32) {
    %c0_i32 = arith.constant 0 : i32
    %c0_i32_0 = arith.constant 0 : i32
    %c0_i32_1 = arith.constant 0 : i32
    return %c0_i32, %c0_i32_0 : i32, i32
  }
  func.func @transform_4(%arg0: i32) -> (i32, i32) {
    %c0_i32 = arith.constant 0 : i32
    %c0_i32_0 = arith.constant 0 : i32
    %c0_i32_1 = arith.constant 0 : i32
    return %c0_i32, %c0_i32_0 : i32, i32
  }
  func.func @transform_5(%arg0: i32) -> (i32, i32) {
    %c0_i32 = arith.constant 0 : i32
    %c0_i32_0 = arith.constant 0 : i32
    %c0_i32_1 = arith.constant 0 : i32
    return %c0_i32, %c0_i32_0 : i32, i32
  }
  func.func @transform_6(%arg0: i32) -> (i32, i32) {
    %c0_i32 = arith.constant 0 : i32
    %c0_i32_0 = arith.constant 0 : i32
    return %arg0, %c0_i32 : i32, i32
  }
}

</mosaic_0001>

<bundles_post_ra>
// kernel: tpu_custom_call.1
= control target key start
LH: loop header
LB: loop body
LE: loop exit
PB: predicated region body
PF: predicated region fallthrough
CT: control target
= control target key end

     0   :  { %11 = vsyncpa [#allocation3], 0  ;;  %s1187_s0 = inlined_call_operand.hbm [shape: f32[16,32], index: 0, kind: input, shape index: {}]   ;;  %s1188_s1 = inlined_call_operand.hbm [shape: f32[32,32], index: 1, kind: input, shape index: {}]   ;;  %s1189_s2 = inlined_call_operand.vmem [shape: f32[1,32], index: 2, kind: input, shape index: {}]   ;;  %s1190_s3 = inlined_call_operand.hbm [shape: f32[32,128], index: 3, kind: input, shape index: {}]   ;;  %s1191_s4 = inlined_call_operand.vmem [shape: f32[1,128], index: 4, kind: input, shape index: {}]   ;;  %s1192_s5 = inlined_call_operand.vmem [shape: f32[1,128], index: 5, kind: input, shape index: {}]   ;;  %s1193_s6 = inlined_call_operand.hbm [shape: f32[16,128], index: 6, kind: output, shape index: {}]  }
   0x1   :  { %13 = vsyncpa [#allocation3 + $0x1], 0 }
   0x2   :  { %14 = vsyncpa [#allocation6], 0 }
   0x3   :  { %15 = vsyncpa [#allocation4], 0 }
   0x4   :  { %17 = vsyncpa [#allocation4 + $0x1], 0  ;;  %s945_s21 = smov 0   ;;  %s947_s22 = smov 0  }
   0x5   :  { %s949_s23 = smov 0   ;;  %s951_s24 = smov 0  }
   0x6 LB: > { %s966_s25 = sadd.s32 4294967295, %s898_s24   ;;  %s599_s26 = sadd.s32 4294967294, %s898_s24   ;;  %s898_s24 = sphi %s951_s24, %s1213_s24   ;;  %s894_s23 = sphi %s949_s23, %s1212_s23   ;;  %s890_s22 = sphi %s947_s22, %s1211_s22   ;;  %s886_s21 = sphi %s945_s21, %s1210_s21  }
   0x7   : > { %p43_p0 = scmp.ne.s32.totalorder %s890_s22, %s886_s21  ;;  %p1194_p1 = scmp.eq.s32.totalorder %s966_s25, 0 }
   0x8   : > { %p178_p3 = scmp.eq.s32.totalorder %s599_s26, 1  ;;  %p600_p5 = scmp.ge.s32.totalorder %s898_s24, 1 }
   0x9   : > { %p975_p4 = por %p1194_p1, %p43_p0  ;;  %p185_p7 = scmp.lt.s32.totalorder %s898_s24, 3 }
   0xa   : > { %p980_p6 = por %p178_p3, %p43_p0  ;;  %s900_s30 = smov [#allocation5]  }
   0xb   : > { %s1197_s27 = scalar_select %p975_p4, 1, 0 }
   0xc   : > { %s1198_s28 = scalar_select %p980_p6, 1, 0 }
   0xd   : > { %p985_p8 = pnand %p600_p5, %p185_p7  ;;  %s197_s7 = sshll.u32 %s900_s30, 4  ;;  %s989_s7 = int_to_ptr.vmem [resolvable:$true] %s197_s7 }
   0xe   : > { %s901_s9 = smov [#allocation7]   ;;  %s742_s13 = scalar_lea.hbm %s1188_s1, 512 }
   0xf   : > { %p675_p9 = pneg %p985_p8  ;;  %s213_s10 = sshll.u32 %s901_s9, 4  ;;  %s1000_s10 = int_to_ptr.vmem [resolvable:$true] %s213_s10 }
  0x10   : > { %p743_p12 = scmp.ne.s32.totalorder %s1188_s1, %s742_s13  ;;  %p749_p5 = scmp.lt.u32.totalorder %s742_s13, %s1188_s1 }
  0x11   : > { %p996_p11 = pnand %p675_p9, %p1194_p1 }
  0x13   : > { %p744_p13 = pneg %p996_p11 }
  0x15   : > { %p745_p0 = pnand %p744_p13, %p743_p12 }
  0x17   : > { %p746_p3 = pneg %p745_p0 }
  0x19   : > { %p751_p7 = pnand %p749_p5, %p746_p3 }
  0x1b   : > { %754 = shalt.err (!%p751_p7)
}
  0x1c   : > { %s755_s18 = scalar_lea.vmem %s989_s7, 512  ;;  %p763_p2 = scmp.lt.s32.totalorder %s989_s7, %s989_s7 }
  0x1d   : > { %p756_p9 = scmp.ne.s32.totalorder %s989_s7, %s755_s18  ;;  %p764_p12 = scmp.lt.s32.totalorder %s755_s18, %s755_s18 }
  0x1f   : > { %p758_p10 = pnand %p756_p9, %p744_p13  ;;  %p765_p0 = por %p764_p12, %p763_p2 }
  0x21   : > { %p759_p1 = pneg %p758_p10 }
  0x23   : > { %p766_p6 = pnand %p765_p0, %p759_p1 }
  0x25   : > { %769 = shalt.err (!%p766_p6)
}
  0x26   : > { %s902_s19 = smov 128   ;;  %s903_s20 = smov 8  }
  0x27   : > { %678 = dma.hbm_to_vmem [thread:$0]  (!%p996_p11), %s1188_s1, 512, %s989_s7, [#allocation6], %s902_s19, %s902_s19, %s903_s20  }
  0x28   : > { %s770_s12 = scalar_lea.hbm %s1190_s3, 512 }
  0x29   : > { %p771_p2 = scmp.ne.s32.totalorder %s1190_s3, %s770_s12  ;;  %p777_p10 = scmp.lt.u32.totalorder %s770_s12, %s1190_s3 }
  0x2b   : > { %p773_p1 = pnand %p771_p2, %p744_p13 }
  0x2d   : > { %p774_p6 = pneg %p773_p1 }
  0x2f   : > { %p779_p3 = pnand %p777_p10, %p774_p6 }
  0x31   : > { %782 = shalt.err (!%p779_p3)
}
  0x32   : > { %s783_s7 = scalar_lea.vmem %s1000_s10, 512  ;;  %p791_p12 = scmp.lt.s32.totalorder %s1000_s10, %s1000_s10 }
  0x33   : > { %p784_p5 = scmp.ne.s32.totalorder %s1000_s10, %s783_s7  ;;  %p792_p0 = scmp.lt.s32.totalorder %s783_s7, %s783_s7 }
  0x35   : > { %p786_p7 = pnand %p784_p5, %p744_p13  ;;  %p793_p2 = por %p792_p0, %p791_p12 }
  0x37   : > { %p787_p9 = pneg %p786_p7 }
  0x39   : > { %p794_p1 = pnand %p793_p2, %p787_p9 }
  0x3b   : > { %797 = shalt.err (!%p794_p1)
}
  0x3c   : > { %681 = dma.hbm_to_vmem [thread:$0]  (!%p996_p11), %s1190_s3, 512, %s1000_s10, [#allocation6], %s902_s19, %s902_s19, %s903_s20  }
  0x3d   : > { %s1055_s26 = sadd.s32 1, %s898_s24   ;;  %s30_s8 = sadd.s32 1, %s894_s23 }
  0x3e   : > { %s27_s30 = ssub.s32 %s898_s24, %s1055_s26  ;;  %p37_p13 = scmp.ne.s32.totalorder %s894_s23, %s890_s22 }
  0x3f   : > { %p28_p6 = scmp.eq.s32.totalorder %s27_s30, 0  ;;  %p38_p10 = scmp.eq.s32.totalorder %s898_s24, 0 }
  0x40   : > { %p1201_p3 = scmp.eq.s32.totalorder %s966_s25, 1  ;;  %p692_p7 = scmp.lt.s32.totalorder %s898_s24, 2 }
  0x41   : > { %s1071_s11 = scalar_select %p28_p6, %s894_s23, %s30_s8  }
  0x42   : > { %p1065_p5 = por %p1201_p3, %p37_p13  ;;  %p39_p9 = por %p38_p10, %p37_p13 }
  0x43   : > { %s233_s12 = sand.u32 1, %s894_s23   ;;  %s605_s10 = sshll.u32 %s898_s24, 7 }
  0x44   : > { %s1202_s9 = scalar_select %p1065_p5, 1, 0 }
  0x45   : > { %s604_s13 = sshll.u32 %s233_s12, 3  ;;  %s1078_s14 = scalar_lea.hbm %s1187_s0, %s605_s10 }
  0x46   : > { %s237_s15 = scalar_lea.vmem [#allocation2], %s604_s13  ;;  %p1082_p11 = pnand %p692_p7, %p39_p9 }
  0x47   : > { %s244_s16 = sshll.u32 %s237_s15, 4  ;;  %s234_s17 = scalar_lea.sflag [#allocation3], %s233_s12  ;;  %s1080_s16 = int_to_ptr.vmem [resolvable:$true] %s244_s16 }
  0x48   : > { %s798_s18 = scalar_lea.hbm %s1078_s14, 128  ;;  %p800_p0 = pneg %p1082_p11 }
  0x49   : > { %p799_p12 = scmp.ne.s32.totalorder %s1078_s14, %s798_s18  ;;  %s803_s13 = scalar_lea.hbm %s1187_s0, 256 }
  0x4a   : > { %p804_p13 = scmp.lt.u32.totalorder %s1078_s14, %s1187_s0  ;;  %p805_p6 = scmp.lt.u32.totalorder %s803_s13, %s798_s18 }
  0x4b   : > { %p801_p2 = pnand %p800_p0, %p799_p12  ;;  %p807_p3 = scmp.lt.u32.totalorder %s798_s18, %s1078_s14 }
  0x4c   : > { %p806_p10 = por %p805_p6, %p804_p13 }
  0x4d   : > { %p802_p1 = pneg %p801_p2 }
  0x4e   : > { %p808_p7 = por %p807_p3, %p806_p10 }
  0x50   : > { %p809_p9 = pnand %p808_p7, %p802_p1 }
  0x52   : > { %812 = shalt.err (!%p809_p9)
}
  0x53   : > { %s813_s12 = scalar_lea.vmem %s1080_s16, 128  ;;  %s904_s20 = smov [#allocation2]  }
  0x54   : > { %p814_p12 = scmp.ne.s32.totalorder %s1080_s16, %s813_s12  ;;  %s818_s15 = sshll.u32 %s904_s20, 4  ;;  %s819_s15 = int_to_ptr.vmem [resolvable:$false] %s818_s15 }
  0x55   : > { %s820_s8 = scalar_lea.vmem %s819_s15, 256  ;;  %p821_p4 = scmp.lt.s32.totalorder %s1080_s16, %s819_s15 }
  0x56   : > { %p816_p2 = pnand %p814_p12, %p800_p0  ;;  %p822_p13 = scmp.lt.s32.totalorder %s820_s8, %s813_s12 }
  0x58   : > { %p817_p5 = pneg %p816_p2  ;;  %p823_p6 = por %p822_p13, %p821_p4 }
  0x5a   : > { %p824_p10 = pnand %p823_p6, %p817_p5 }
  0x5c   : > { %827 = shalt.err (!%p824_p10)
}
  0x5d   : > { %685 = dma.hbm_to_vmem [thread:$0]  (!%p1082_p11), %s1078_s14, 128, %s1080_s16, %s234_s17  }
  0x5e   : > { %253 = sbr.rel (%p985_p8) target bundleno = 596 (0x254), region = 44  ;;  %s1114_s18 = sand.u32 (!%p985_p8), 1, %s890_s22  }
  0x5f   : > { %s607_s30 = sshll.u32 (!%p985_p8), %s1114_s18, 3  ;;  %s256_s13 = scalar_lea.sflag (!%p985_p8), [#allocation3], %s1114_s18 }
  0x60   : > { %s259_s10 = scalar_lea.vmem (!%p985_p8), [#allocation2], %s607_s30  ;;  %p1204_p4 = scmp.ne.s32.totalorder (!%p985_p8), %s1197_s27, 0 }
  0x65   : > { %873 = dma.done.wait (%p1204_p4), %s256_s13, 128  }
  0x66   : > { %875 = vsyncadd (%p1204_p4), %s256_s13, 4294967168  ;;  %p1205_p5 = scmp.eq.s32.totalorder %s966_s25, 0 }
  0x68   : > { %877 = dma.done.wait (%p1205_p5), [#allocation6], 1024   ;;  %p1206_p8 = pmov %p1205_p5 }
  0x69   : > { %v905_v0 = vmov 0.0|0.0   ;;  %vm906_vm0 = vmmov 0   ;;  %v907_v1 = vmov 0.0   ;;  %v297_v2 = vld [vmem:[#allocation5] sm:$0xff]  ;;  %v298_v3 = vld [vmem:[#allocation5 + $0x8] sm:$0xff]  ;;  %v299_v4 = vld [vmem:[#allocation5 + $0x10] sm:$0xff]  ;;  %v489_v29 = vlaneseq }
  0x6a   : > { %879 = vsyncadd (%p1206_p8), [#allocation6], 4294966272  ;;  %651 = vmatprep.subr.bf16.mxu0 %v905_v0  ;;  %637 = vmatprep.mubr.msk.f32.mxu0 %vm906_vm0, %v907_v1  ;;  %v652_v5 = vpack.c.bf16 %v298_v3, %v297_v2  ;;  %v300_v6 = vld [vmem:[#allocation5 + $0x18] sm:$0xff]  ;;  %v383_v7 = vld [vmem:[#allocation7] sm:$0xff]  ;;  %vm308_vm1 = vcmask 261120   ;;  %v908_v35 = vmov 0  }
  0x6b   : > { %657 = vmatprep.subr.bf16.mxu1 %v905_v0  ;;  %648 = vmatprep.mubr.msk.f32.mxu1 %vm906_vm0, %v907_v1  ;;  %v384_v8 = vld [vmem:[#allocation7 + $0x8] sm:$0xff]  ;;  %v655_v9 = vpack.c.bf16 %v300_v6, %v299_v4  ;;  %v296_v11 = vld [vmem:[%s259_s10] sm:$0xff]  ;;  %v490_v31 = vshrl.u32 %v489_v29, 7  ;;  %s616_s19 = sshll.u32 %s966_s25, 7  ;;  %s295_s12 = scalar_lea.vmem [#allocation8], %s607_s30 }
  0x6c   : > { %653 = vmatpush3.bf16.msra.mxu0 %v652_v5  ;;  %v658_v10 = vpack.c.bf16 %v384_v8, %v383_v7  ;;  %v385_v12 = vld [vmem:[#allocation7 + $0x10] sm:$0xff]  ;;  %v386_v13 = vld [vmem:[#allocation7 + $0x18] sm:$0xff]  ;;  %s510_s20 = sshll.u32 %s295_s12, 4  ;;  %s1143_s13 = scalar_lea.hbm %s1193_s6, %s616_s19  ;;  %s1145_s20 = int_to_ptr.vmem [resolvable:$true] %s510_s20 }
  0x6d   : > { %654 = vmatprep.subr.bf16.mxu0 %v905_v0  ;;  %v661_v14 = vpack.c.bf16 %v386_v13, %v385_v12  ;;  %v611_v15 = vld [vmem:[%s1189_s2] ss:$0 sm:$0xff]  ;;  %v491_v33 = vsub.s32 0, %v490_v31  ;;  %s497_s25 = scalar_lea.sflag [#allocation4], %s1114_s18  ;;  %s828_s30 = scalar_lea.vmem %s1145_s20, 128 }
  0x6e   : > { %659 = vmatpush3.bf16.msra.mxu1 %v658_v10  ;;  %v613_v20 = vld [vmem:[%s1191_s4] ss:$0 sm:$0xff]  ;;  %p829_p11 = scmp.ne.s32.totalorder %s1145_s20, %s828_s30  ;;  %p1207_p0 = scmp.ne.s32.totalorder %s1202_s9, 0 }
  0x6f   : > { %660 = vmatprep.subr.bf16.mxu1 %v905_v0  ;;  %v467_v30 = vld [vmem:[%s1192_s5] sm:$0x1]  ;;  %s909_s10 = smov [#allocation8]  }
  0x70   : > { %656 = vmatpush3.bf16.msra.mxu0 %v655_v9  ;;  %vm468_vm2 = vcmp.ne.f32.partialorder %v467_v30, 0.0  ;;  %p830_p1 = pnand %p829_p11, %p1207_p0  ;;  %s832_s27 = sshll.u32 %s909_s10, 4  ;;  %s833_s27 = int_to_ptr.vmem [resolvable:$false] %s832_s27 }
  0x71   : > { %v488_v36 = vsel %vm468_vm2, 1, %v908_v35  ;;  %s834_s29 = scalar_lea.vmem %s833_s27, 256  ;;  %p835_p7 = scmp.lt.s32.totalorder %s1145_s20, %s833_s27 }
  0x72   : > { %662 = vmatpush3.bf16.msra.mxu1 %v661_v14  ;;  %v492_v39 = vrot.slane %v488_v36, %v491_v33  ;;  %p831_p3 = pneg %p830_p1  ;;  %p836_p9 = scmp.lt.s32.totalorder %s834_s29, %s828_s30 }
  0x73   : > { %638 = vmatmul.mubr.msk.f32.vlgmr.msra.gmra.mrb[0].mxu0 %vm308_vm1, %v296_v11 }
  0x74   : > { %vm493_vm4 = vcmp.eq.s32.totalorder %v492_v39, 1  ;;  %p837_p12 = por %p836_p9, %p835_p7 }
  0x76   : > { %p838_p2 = pnand %p837_p12, %p831_p3 }
 0x146   : > { %v378_v16 = vpop.f32.mrb[0].mxu0 }
 0x147   : > { %v379_v17 = vadd.f32 %v611_v15, %v378_v16  ;;  %v639_v18 = vpop.f32.mrb[1].mxu0 }
 0x149   : > { %v382_v19 = vmax.f32 %v379_v17, 0.0 }
 0x14b   : > { %649 = vmatmul.mubr.msk.f32.vlgmr.msra.gmra.mrb[0].mxu1 %vm308_vm1, %v382_v19 }
 0x21e   : > { %v463_v21 = vpop.f32.mrb[0].mxu1 }
 0x21f   : > { %v464_v22 = vadd.f32 %v613_v20, %v463_v21  ;;  %v650_v23 = vpop.f32.mrb[1].mxu1 }
 0x221   : > { %v473_v24 = vand.u32 2147483647, %v464_v22  ;;  %v470_v42 = vmax.f32 %v464_v22, 0.0  ;;  %vm471_vm5 = vcmp.ne.f32.partialorder %v464_v22, %v464_v22 }
 0x223   : > { %v474_v25 = vsub.f32 0.0, %v473_v24 }
 0x225   : > { %v475_v26 = vmul.f32 1.442695, %v474_v25 }
 0x227   : > { %736 = vpow2.f32 %v475_v26 }
 0x231   : > { %v737_v27 = vpop.eup %736 }
 0x232   : > { %v477_v28 = vadd.f32 1.0, %v737_v27  ;;  %v480_v32 = vmul.f32 -0.5, %v737_v27  ;;  %v483_v37 = vand.u32 2147483647, %v737_v27 }
 0x234   : > { %738 = vlog2.f32 %v477_v28  ;;  %v481_v34 = vadd.f32 1.0, %v480_v32  ;;  %vm484_vm3 = vcmp.lt.f32.partialorder %v483_v37, 0.0004427343 }
 0x235   : > { %740 = vtanh.f32 %v464_v22 }
 0x236   : > { %v482_v41 = vmul.f32 %v737_v27, %v481_v34 }
 0x23e   : > { %v739_v38 = vpop.eup %738 }
 0x23f   : > { %v479_v40 = vmul.f32 0.6931472, %v739_v38  ;;  %v741_v45 = vpop.eup %740 }
 0x241   : > { %v485_v43 = vsel %vm484_vm3, %v482_v41, %v479_v40 }
 0x242   : > { %v486_v44 = vadd.f32 %v485_v43, %v470_v42 }
 0x244   : > { %v487_v46 = vsel %vm471_vm5, %v464_v22, %v486_v44 }
 0x245   : > { %v494_v47 = vsel %vm493_vm4, %v741_v45, %v487_v46 }
 0x246   : > { %495 = vst [vmem:[%s295_s12] sm:$0xff] %v494_v47 }
 0x247   : > { %841 = shalt.err (!%p838_p2)
}
 0x248   : > { %s842_s18 = scalar_lea.hbm %s1143_s13, 128  ;;  %s846_s7 = scalar_lea.hbm %s1193_s6, 256 }
 0x249   : > { %p843_p13 = scmp.ne.s32.totalorder %s1143_s13, %s842_s18  ;;  %p847_p4 = scmp.lt.u32.totalorder %s1143_s13, %s1193_s6 }
 0x24a   : > { %p848_p5 = scmp.lt.u32.totalorder %s846_s7, %s842_s18  ;;  %p850_p11 = scmp.lt.u32.totalorder %s842_s18, %s1143_s13 }
 0x24b   : > { %p844_p6 = pnand %p843_p13, %p1207_p0 }
 0x24c   : > { %p849_p8 = por %p848_p5, %p847_p4 }
 0x24d   : > { %p845_p10 = pneg %p844_p6 }
 0x24e   : > { %p851_p1 = por %p850_p11, %p849_p8 }
 0x250   : > { %p852_p3 = pnand %p851_p1, %p845_p10 }
 0x252   : > { %855 = shalt.err (!%p852_p3)
}
 0x253   : > { %673 = dma.vmem_to_hbm [thread:$0]  (%p1207_p0), %s1145_s20, 128, %s1143_s13, %s497_s25  }
 0x254 PF: > { %s522_s12 = sand.u32 1, %s886_s21   ;;  %p1208_p7 = scmp.ne.s32.totalorder %s1198_s28, 0 }
 0x255   : > { %p1209_p9 = scmp.ge.s32.totalorder %s898_s24, 2  ;;  %s523_s15 = scalar_lea.sflag [#allocation4], %s522_s12 }
 0x257   : > { %p687_p12 = pnand %p1209_p9, %p1208_p7 }
 0x259   : > { %881 = dma.done.wait (!%p687_p12), %s523_s15, 128  }
 0x25a   : > { %883 = vsyncadd (!%p687_p12), %s523_s15, 4294967168  ;;  %p20_p2 = scmp.ge.s32.totalorder %s1055_s26, 4   ;;  %s1210_s21 = smov %s890_s22 }
 0x25b   : > { %s1211_s22 = smov %s894_s23  ;;  %s1212_s23 = smov %s1071_s11 }
 0x25c   : > { %s1213_s24 = smov %s1055_s26  ;;  %22 = sbr.rel (!%p20_p2) target bundleno = 6 (0x6), region = 97 }
 0x263   :  { %528 = vsyncpa [#allocation3], 1 }
 0x264   :  { %530 = vsyncpa [#allocation3 + $0x1], 1 }
 0x265   :  { %531 = vsyncpa [#allocation6], 1 }
 0x266   :  { %532 = vsyncpa [#allocation4], 1 }
 0x267   :  { %534 = vsyncpa [#allocation4 + $0x1], 1 }

</bundles_post_ra>
